<compile_context>
chip_gen: v7x
topology: tpu7x:2x2x1
jax: 0.10.0
libtpu: 0.0.40
codegen_flags: <defaults>
</compile_context>

<pallas_src>
from functools import partial

import jax
import jax.numpy as jnp
from jax.experimental import pallas as pl
from jax.experimental.pallas import tpu as pltpu


def _round_up(x, m):
    return ((x + m - 1) // m) * m


def _cdiv(a, b):
    return (a + b - 1) // b


def _make_bow_kernel(resident_weight, tk):
    """Kernel factory. One (batch_tile, vocab_tile) grid step accumulates
    x_tile @ w_tile into the f32 output block (resident across k); on the last
    vocab tile it adds the bias and applies a numerically-stable log_softmax."""

    def kernel(x_ref, w_ref, b_ref, o_ref):
        k = pl.program_id(1)

        @pl.when(k == 0)
        def _():
            o_ref[...] = jnp.zeros_like(o_ref)

        if resident_weight:
            # Whole [V_pad, L_pad] weight lives in VMEM; slice this step's
            # K-tile out of it (start is a multiple of tk, itself a multiple
            # of 128, so the access stays tile-aligned).
            start = pl.multiple_of(k * tk, tk)
            w_tile = w_ref[pl.ds(start, tk), :]
        else:
            w_tile = w_ref[...]

        # bf16 (or f32) operands, f32 accumulation on the MXU.
        o_ref[...] += jnp.dot(x_ref[...], w_tile,
                              preferred_element_type=jnp.float32)

        @pl.when(k == pl.num_programs(1) - 1)
        def _():
            logits = o_ref[...] + b_ref[...]          # [tb, L_pad], lane-dense
            # Padded label lanes carry bias = -1e30 (f32!) -> exp underflows to
            # 0, so they perturb neither the row max nor the logsumexp.
            m = jnp.max(logits, axis=-1, keepdims=True)
            shifted = logits - m
            lse = jnp.log(jnp.sum(jnp.exp(shifted), axis=-1, keepdims=True))
            o_ref[...] = (shifted - lse).astype(o_ref.dtype)

    return kernel


def prepare_bow_params(weight, bias, *, compute_dtype=jnp.bfloat16,
                       max_k_tile=8192):
    """One-time, cacheable layout plumbing for the nn.Linear parameters.

    weight: [L, V] (PyTorch nn.Linear convention), bias: [L]
    returns (w_t, b_p) with
      w_t: [V_pad, L_pad] pre-transposed, padded, cast to compute_dtype
      b_p: [1, L_pad] f32, padded lanes = -1e30 sentinel
    """
    L, V = weight.shape
    L_pad = _round_up(L, 128)                       # lane-dense output last dim
    tk = min(_round_up(V, 128), max_k_tile)         # vocab (reduction) tile
    V_pad = _round_up(V, tk)

    w_t = jnp.zeros((V_pad, L_pad), compute_dtype).at[:V, :L].set(
        weight.T.astype(compute_dtype))             # pre-transposed: [V, L]
    b_p = jnp.full((1, L_pad), -1e30, jnp.float32).at[0, :L].set(
        bias.astype(jnp.float32))                   # MUST stay f32 (sentinel)
    return w_t, b_p


def bow_classifier_forward(bow_vec, w_t, b_p, *, num_labels,
                           max_batch_tile=256, max_k_tile=8192):
    """log_softmax(bow_vec @ weight.T + bias, axis=-1) via a K-tiled Pallas kernel.

    bow_vec: [B, V] float; w_t/b_p from prepare_bow_params (same max_k_tile).
    returns: [B, num_labels] float32 log-probabilities.
    """
    B, V = bow_vec.shape
    V_pad, L_pad = w_t.shape
    compute_dtype = w_t.dtype
    itemsize = jnp.dtype(compute_dtype).itemsize

    # ---- batch tiling: sublane-aligned; if the whole batch fits in one tile,
    # split it in two so v7x's second TensorCore gets work (no-op on v5e/v6e).
    B8 = _round_up(B, 8)
    if B8 <= max_batch_tile:
        tb = max(8, _round_up(_cdiv(B8, 2), 8))
    else:
        tb = max_batch_tile
    B_pad = _round_up(B8, tb)

    # ---- vocab (reduction) tiling -- matches prepare_bow_params' choice.
    tk = min(V_pad, max_k_tile)
    assert V_pad % tk == 0

    # Keep the whole pre-transposed weight VMEM-resident when small enough:
    # it is then DMA'd once instead of once per batch tile.
    resident_weight = V_pad * L_pad * itemsize <= 8 * 1024 * 1024

    # ---- per-call activation plumbing (skipped when already aligned & cast).
    if (B, V) == (B_pad, V_pad) and bow_vec.dtype == compute_dtype:
        x_p = bow_vec
    else:
        x_p = jnp.zeros((B_pad, V_pad), compute_dtype).at[:B, :V].set(
            bow_vec.astype(compute_dtype))

    grid = (B_pad // tb, V_pad // tk)

    if resident_weight:
        w_spec = pl.BlockSpec((V_pad, L_pad), lambda i, k: (0, 0))
        w_rows = V_pad
    else:
        w_spec = pl.BlockSpec((tk, L_pad), lambda i, k: (k, 0))
        w_rows = tk

    # Scoped-VMEM budget: double-buffered inputs + resident f32 output tile.
    # Capped at 64 MiB so it never exceeds v7x's physical VMEM.
    vmem_est = (2 * tb * tk * itemsize            # x tiles (double-buffered)
                + 2 * w_rows * L_pad * itemsize   # weight block(s)
                + 2 * tb * L_pad * 4              # f32 output/accumulator
                + 2 * L_pad * 4)                  # bias
    vmem_limit = int(min(64 * 1024 * 1024,
                         max(32 * 1024 * 1024, int(vmem_est * 1.5))))

    out = pl.pallas_call(
        _make_bow_kernel(resident_weight, tk),
        out_shape=jax.ShapeDtypeStruct((B_pad, L_pad), jnp.float32),
        grid_spec=pltpu.PrefetchScalarGridSpec(
            num_scalar_prefetch=0,
            grid=grid,
            in_specs=[
                pl.BlockSpec((tb, tk), lambda i, k: (i, k)),    # x tile (streamed)
                w_spec,                                         # weight
                pl.BlockSpec((1, L_pad), lambda i, k: (0, 0)),  # bias (resident)
            ],
            out_specs=pl.BlockSpec((tb, L_pad), lambda i, k: (i, 0)),
        ),
        compiler_params=pltpu.CompilerParams(
            # batch tiles are independent (megacore-shardable on v7x);
            # vocab is the serial accumulation axis.
            dimension_semantics=("parallel", "arbitrary"),
            vmem_limit_bytes=vmem_limit,
        ),
    )(x_p, w_t, b_p)

    # Strip padding (batch rows and label lanes) outside the kernel.
    return out[:B, :num_labels]


def reference_forward(bow_vec, weight, bias):
    logits = bow_vec @ weight.T + bias
    return jax.nn.log_softmax(logits, axis=-1)


if __name__ == "__main__":
    # Module hyperparameters (small, consistent with BoWClassifier.__init__).
    NUM_LABELS = 4
    VOCAB_SIZE = 32
    BATCH = 2

    key = jax.random.PRNGKey(0)
    k_x, k_w, k_b = jax.random.split(key, 3)

    # Deterministic synthetic parameters (nn.Linear shapes: W [L, V], b [L]).
    bound = 1.0 / (VOCAB_SIZE ** 0.5)
    weight = jax.random.uniform(k_w, (NUM_LABELS, VOCAB_SIZE),
                                jnp.float32, -bound, bound)
    bias = jax.random.uniform(k_b, (NUM_LABELS,), jnp.float32, -bound, bound)

    # Bag-of-words counts (non-negative floats; <= 256 so exact in bf16).
    bow_vec = jax.random.uniform(k_x, (BATCH, VOCAB_SIZE), jnp.float32, 0.0, 3.0)

    fwd = jax.jit(bow_classifier_forward,
                  static_argnames=("num_labels", "max_batch_tile", "max_k_tile"))

    ref = reference_forward(bow_vec, weight, bias)

    # Production path: bf16 streaming, f32 accumulate (default).
    w_t, b_p = prepare_bow_params(weight, bias)            # one-time, cacheable
    out = jax.block_until_ready(fwd(bow_vec, w_t, b_p, num_labels=NUM_LABELS))
    assert out.shape == (BATCH, NUM_LABELS)
    assert jnp.allclose(out, ref, atol=5e-2, rtol=5e-2)    # bf16 streaming tol

    # f32 streaming path: tight numerical check against the reference.
    w_t32, b_p32 = prepare_bow_params(weight, bias, compute_dtype=jnp.float32)
    out32 = jax.block_until_ready(fwd(bow_vec, w_t32, b_p32,
                                      num_labels=NUM_LABELS))
    assert out32.shape == (BATCH, NUM_LABELS)
    assert jnp.allclose(out32, ref, atol=1e-5, rtol=1e-5)

    print("KERNEL_OK")
</pallas_src>

<mosaic_0001>
module attributes {stable_mosaic.version = 11 : i64} {
  func.func @kernel(%arg0: i32, %arg1: i32, %arg2: memref<8x128xbf16, #tpu.memory_space<vmem>>, %arg3: memref<128x128xbf16, #tpu.memory_space<vmem>>, %arg4: memref<1x128xf32, #tpu.memory_space<vmem>>, %arg5: memref<8x128xf32, #tpu.memory_space<vmem>>) attributes {dimension_semantics = [#tpu.dimension_semantics<parallel>, #tpu.dimension_semantics<arbitrary>], iteration_bounds = array<i64: 1, 1>, scalar_prefetch = 0 : i64, scratch_operands = 0 : i64, tpu.core_type = #tpu.core_type<tc>, window_params = [{transform_indices = @transform_0, window_bounds = array<i64: 8, 128>}, {pipeline_mode = #tpu.pipeline_mode<synchronous>, transform_indices = @transform_1, window_bounds = array<i64: 128, 128>}, {pipeline_mode = #tpu.pipeline_mode<synchronous>, transform_indices = @transform_2, window_bounds = array<i64: 1, 128>}, {transform_indices = @transform_3, window_bounds = array<i64: 8, 128>}]} {
    %c0_i32 = arith.constant 0 : i32
    %0 = arith.cmpi eq, %arg1, %c0_i32 : i32
    %1 = arith.extui %0 : i1 to i32
    %c0_i32_0 = arith.constant 0 : i32
    %2 = arith.cmpi ne, %1, %c0_i32_0 : i32
    scf.if %2 {
      %cst_9 = arith.constant 0.000000e+00 : f32
      %15 = vector.broadcast %cst_9 : f32 to vector<8x128xf32>
      %c0_10 = arith.constant 0 : index
      %c0_11 = arith.constant 0 : index
      %16 = vector.load %arg5[%c0_10, %c0_11] : memref<8x128xf32, #tpu.memory_space<vmem>>, vector<8x128xf32>
      tpu.vector_store %arg5[%c0_10, %c0_11], %15 {strides = array<i32>} : memref<8x128xf32, #tpu.memory_space<vmem>>, vector<8x128xf32>,
    } else {
    }
    %c128_i32 = arith.constant 128 : i32
    %3 = arith.muli %arg1, %c128_i32 : i32
    %4 = tpu.assume_multiple %3, 128 : i32
    %5 = arith.index_cast %4 : i32 to index
    %c0 = arith.constant 0 : index
    %6 = vector.load %arg3[%5, %c0] : memref<128x128xbf16, #tpu.memory_space<vmem>>, vector<128x128xbf16>
    %c0_1 = arith.constant 0 : index
    %c0_2 = arith.constant 0 : index
    %7 = vector.load %arg5[%c0_1, %c0_2] : memref<8x128xf32, #tpu.memory_space<vmem>>, vector<8x128xf32>
    %c0_3 = arith.constant 0 : index
    %c0_4 = arith.constant 0 : index
    %8 = vector.load %arg2[%c0_3, %c0_4] : memref<8x128xbf16, #tpu.memory_space<vmem>>, vector<8x128xbf16>
    %cst = arith.constant dense<0.000000e+00> : vector<8x128xf32>
    %9 = tpu.matmul %8, %6, %cst {dimension_numbers = #tpu.dot_dimension_numbers<[1], [0], [0], [1], [0, 0, 1, 1], [], []>} : vector<8x128xbf16>, vector<128x128xbf16>, vector<8x128xf32> -> vector<8x128xf32>
    %10 = arith.addf %7, %9 : vector<8x128xf32>
    %c0_5 = arith.constant 0 : index
    %c0_6 = arith.constant 0 : index
    %11 = vector.load %arg5[%c0_5, %c0_6] : memref<8x128xf32, #tpu.memory_space<vmem>>, vector<8x128xf32>
    tpu.vector_store %arg5[%c0_5, %c0_6], %10 {strides = array<i32>} : memref<8x128xf32, #tpu.memory_space<vmem>>, vector<8x128xf32>,
    %c0_i32_7 = arith.constant 0 : i32
    %12 = arith.cmpi eq, %arg1, %c0_i32_7 : i32
    %13 = arith.extui %12 : i1 to i32
    %c0_i32_8 = arith.constant 0 : i32
    %14 = arith.cmpi ne, %13, %c0_i32_8 : i32
    scf.if %14 {
      %c0_9 = arith.constant 0 : index
      %c0_10 = arith.constant 0 : index
      %15 = vector.load %arg5[%c0_9, %c0_10] : memref<8x128xf32, #tpu.memory_space<vmem>>, vector<8x128xf32>
      %c0_11 = arith.constant 0 : index
      %c0_12 = arith.constant 0 : index
      %16 = vector.load %arg4[%c0_11, %c0_12] : memref<1x128xf32, #tpu.memory_space<vmem>>, vector<1x128xf32>
      %17 = vector.broadcast %16 : vector<1x128xf32> to vector<8x128xf32>
      %18 = arith.addf %15, %17 : vector<8x128xf32>
      %cst_13 = arith.constant dense<0xFF800000> : vector<8xf32>
      %19 = vector.multi_reduction <maximumf>, %18, %cst_13 [1] : vector<8x128xf32> to vector<8xf32>
      %20 = vector.shape_cast %19 : vector<8xf32> to vector<8x1xf32>
      %21 = vector.broadcast %20 : vector<8x1xf32> to vector<8x128xf32>
      %22 = arith.subf %18, %21 : vector<8x128xf32>
      %23 = math.exp %22 : vector<8x128xf32>
      %cst_14 = arith.constant dense<0.000000e+00> : vector<8xf32>
      %24 = vector.multi_reduction <add>, %23, %cst_14 [1] : vector<8x128xf32> to vector<8xf32>
      %25 = vector.shape_cast %24 : vector<8xf32> to vector<8x1xf32>
      %26 = math.log %25 : vector<8x1xf32>
      %27 = vector.broadcast %26 : vector<8x1xf32> to vector<8x128xf32>
      %28 = arith.subf %22, %27 : vector<8x128xf32>
      %c0_15 = arith.constant 0 : index
      %c0_16 = arith.constant 0 : index
      %29 = vector.load %arg5[%c0_15, %c0_16] : memref<8x128xf32, #tpu.memory_space<vmem>>, vector<8x128xf32>
      tpu.vector_store %arg5[%c0_15, %c0_16], %28 {strides = array<i32>} : memref<8x128xf32, #tpu.memory_space<vmem>>, vector<8x128xf32>,
    } else {
    }
    return
  }
  func.func @transform_0(%arg0: i32, %arg1: i32) -> (i32, i32) {
    %c0_i32 = arith.constant 0 : i32
    return %arg0, %arg1 : i32, i32
  }
  func.func @transform_1(%arg0: i32, %arg1: i32) -> (i32, i32) {
    %c0_i32 = arith.constant 0 : i32
    %c0_i32_0 = arith.constant 0 : i32
    %c0_i32_1 = arith.constant 0 : i32
    return %c0_i32, %c0_i32_0 : i32, i32
  }
  func.func @transform_2(%arg0: i32, %arg1: i32) -> (i32, i32) {
    %c0_i32 = arith.constant 0 : i32
    %c0_i32_0 = arith.constant 0 : i32
    %c0_i32_1 = arith.constant 0 : i32
    return %c0_i32, %c0_i32_0 : i32, i32
  }
  func.func @transform_3(%arg0: i32, %arg1: i32) -> (i32, i32) {
    %c0_i32 = arith.constant 0 : i32
    %c0_i32_0 = arith.constant 0 : i32
    return %arg0, %c0_i32 : i32, i32
  }
}

</mosaic_0001>

<bundles_post_ra>
// kernel: bow_classifier_forward.1
= control target key start
LH: loop header
LB: loop body
LE: loop exit
PB: predicated region body
PF: predicated region fallthrough
CT: control target
= control target key end

     0   :  { %8 = vsyncpa [#allocation3], 0  ;;  %s256_s12 = smov [#allocation2]   ;;  %s302_s0 = inlined_call_operand.vmem [shape: bf16[8,128], index: 0, kind: input, shape index: {}]   ;;  %s303_s1 = inlined_call_operand.hbm [shape: bf16[128,128], index: 1, kind: input, shape index: {}]   ;;  %s304_s2 = inlined_call_operand.vmem [shape: f32[1,128], index: 2, kind: input, shape index: {}]   ;;  %s305_s3 = inlined_call_operand.vmem [shape: f32[8,128], index: 3, kind: output, shape index: {}]  }
   0x1   :  { %s16_s13 = sshll.u32 %s256_s12, 4  ;;  %s232_s16 = scalar_lea.hbm %s303_s1, 1024  ;;  %s17_s13 = int_to_ptr.vmem [resolvable:$true] %s16_s13 }
   0x2   :  { %p233_p0 = scmp.ne.s32.totalorder %s303_s1, %s232_s16  ;;  %p236_p1 = scmp.lt.u32.totalorder %s232_s16, %s303_s1 }
   0x4   :  { %p238_p2 = pnand %p236_p1, %p233_p0 }
   0x6   :  { %241 = shalt.err (!%p238_p2)
}
   0x7   :  { %s242_s21 = scalar_lea.vmem %s17_s13, 1024  ;;  %p247_p4 = scmp.lt.s32.totalorder %s17_s13, %s17_s13 }
   0x8   :  { %p243_p3 = scmp.ne.s32.totalorder %s17_s13, %s242_s21  ;;  %p248_p5 = scmp.lt.s32.totalorder %s242_s21, %s242_s21 }
   0xa   :  { %p249_p6 = por %p248_p5, %p247_p4 }
   0xc   :  { %p250_p7 = pnand %p249_p6, %p243_p3 }
   0xe   :  { %253 = shalt.err (!%p250_p7)
}
   0xf   :  { %s257_s22 = smov 64   ;;  %s258_s23 = smov 4  }
  0x10   :  { %22 = dma.hbm_to_vmem [thread:$0]  %s303_s1, 1024, %s17_s13, [#allocation3], %s257_s22, %s257_s22, %s258_s23  }
  0x11   :  { %254 = dma.done.wait [#allocation3], 1024  }
  0x12   :  { %255 = vsyncadd [#allocation3], 4294966272  ;;  %v259_v0 = vmov 0.0   ;;  %vm260_vm0 = vmmov 0   ;;  %v220_v1 = vld [vmem:[#allocation2] sm:$0xff]   ;;  %v221_v2 = vld [vmem:[#allocation2 + $0x8] sm:$0xff]  }
  0x13   :  { %195 = vmatprep.subr.bf16.mxu0 %v259_v0  ;;  %211 = vmatprep.mubr.msk.bf16.mxu0 %vm260_vm0, %v259_v0  ;;  %v222_v3 = vld [vmem:[#allocation2 + $0x10] sm:$0xff]   ;;  %v223_v4 = vld [vmem:[#allocation2 + $0x18] sm:$0xff]   ;;  %v224_v5 = vld [vmem:[#allocation2 + $0x20] sm:$0xff]  }
  0x14   :  { %196 = vmatpush3.bf16.msra.mxu0 %v220_v1  ;;  %v225_v6 = vld [vmem:[#allocation2 + $0x28] sm:$0xff]   ;;  %v226_v7 = vld [vmem:[#allocation2 + $0x30] sm:$0xff]   ;;  %v227_v8 = vld [vmem:[#allocation2 + $0x38] sm:$0xff]  }
  0x15   :  { %197 = vmatprep.subr.bf16.mxu0 %v259_v0  ;;  %v56_v9 = vld [vmem:[%s302_s0] sm:$0xf] }
  0x16   :  { %v185_v11 = vld [vmem:[%s304_s2] ss:$0 sm:$0xff] }
  0x18   :  { %198 = vmatpush3.bf16.msra.mxu0 %v221_v2 }
  0x19   :  { %199 = vmatprep.subr.bf16.mxu0 %v259_v0 }
  0x1c   :  { %200 = vmatpush3.bf16.msra.mxu0 %v222_v3 }
  0x1d   :  { %201 = vmatprep.subr.bf16.mxu0 %v259_v0 }
  0x20   :  { %202 = vmatpush3.bf16.msra.mxu0 %v223_v4 }
  0x21   :  { %203 = vmatprep.subr.bf16.mxu0 %v259_v0 }
  0x24   :  { %204 = vmatpush3.bf16.msra.mxu0 %v224_v5 }
  0x25   :  { %205 = vmatprep.subr.bf16.mxu0 %v259_v0 }
  0x28   :  { %206 = vmatpush3.bf16.msra.mxu0 %v225_v6 }
  0x29   :  { %207 = vmatprep.subr.bf16.mxu0 %v259_v0 }
  0x2c   :  { %208 = vmatpush3.bf16.msra.mxu0 %v226_v7 }
  0x2d   :  { %209 = vmatprep.subr.bf16.mxu0 %v259_v0 }
  0x30   :  { %210 = vmatpush3.bf16.msra.mxu0 %v227_v8 }
  0x33   :  { %212 = vmatmul.mubr.bf16.vlgmr.msra.gmra.mrb[0].mxu0 %v56_v9 }
 0x106   :  { %v139_v10 = vpop.f32.mrb[0].mxu0 }
 0x107   :  { %v213_v12 = vpop.f32.mrb[1].mxu0  ;;  %v158_v15 = vadd.f32 %v185_v11, %v139_v10 }
 0x108   :  { %v142_v13 = vpop.f32.mrb[2].mxu0 }
 0x109   :  { %v214_v14 = vpop.f32.mrb[3].mxu0  ;;  %159 = vmax.xlane.f32.xlu0 %v158_v15 }
 0x196   :  { %v160_v16 = vpop.xlane.xlu0 %159 }
 0x197   :  { %v161_v17 = vsub.f32 %v158_v15, %v160_v16 }
 0x199   :  { %v162_v18 = vmul.f32 1.442695, %v161_v17 }
 0x19b   :  { %228 = vpow2.f32 %v162_v18 }
 0x1a5   :  { %v229_v19 = vpop.eup %228 }
 0x1a6   :  { %164 = vadd.xlane.f32.xlu0 %v229_v19 }
 0x233   :  { %v165_v20 = vpop.xlane.xlu0 %164 }
 0x234   :  { %230 = vlog2.f32 %v165_v20 }
 0x23e   :  { %v231_v21 = vpop.eup %230 }
 0x23f   :  { %v167_v22 = vmul.f32 0.6931472, %v231_v21 }
 0x241   :  { %v168_v23 = vsub.f32 %v161_v17, %v167_v22 }
 0x243   :  { %169 = vst [vmem:[%s305_s3] sm:$0xff] %v168_v23 }
 0x244   :  { %174 = vsyncpa [#allocation3], 1 }

</bundles_post_ra>
